<compile_context>
chip_gen: v7x
topology: tpu7x:2x2x1
jax: 0.10.0
libtpu: 0.0.40
codegen_flags: <defaults>
</compile_context>

<pallas_src>
import jax
import jax.numpy as jnp
from jax.experimental import pallas as pl
from jax.experimental.pallas import tpu as pltpu


def mlp_kernel(xT_ref, w1_ref, w2_ref, w3c_ref, o_ref):
    # xT_ref : (F,  TB) bf16  -- batch tile on the lane axis
    # w1_ref : (H1, F ) bf16  -- torch.nn.Linear layout (out, in), resident
    # w2_ref : (H2, H1) bf16  -- resident
    # w3c_ref: (H2, 1 ) f32   -- last row of torch W3, as a column, resident
    # o_ref  : (1,  TB) f32   -- lane-dense output tile
    xT = xT_ref[...]
    # Layer 1: (H1, F) @ (F, TB) -> (H1, TB); f32 accumulate, ReLU in f32.
    h1 = jnp.maximum(
        jnp.dot(w1_ref[...], xT, preferred_element_type=jnp.float32), 0.0)
    # Layer 2: cast to bf16 only at the MXU boundary.
    h2 = jnp.maximum(
        jnp.dot(w2_ref[...], h1.astype(w2_ref.dtype),
                preferred_element_type=jnp.float32), 0.0)
    # Layer 3 fused with the [:, -1] select: only the last output unit is
    # needed, so use broadcast-multiply + sublane reduce (VPU/XLU) instead of
    # an N=1 MXU matmul. Result is a lane-dense (1, TB) row.
    o_ref[...] = jnp.sum(h2 * w3c_ref[...], axis=0,
                         keepdims=True).astype(o_ref.dtype)


def mlpnet_forward(x, w1, w2, w3, *, block_b=2048):
    """MLPnet forward pass.

    x : (B, n_features) float32
    w1: (n_hidden0, n_features)   torch.nn.Linear weight layout (out, in)
    w2: (n_hidden1, n_hidden0)
    w3: (n_output,  n_hidden1)
    returns (B,) == (relu(relu(x @ w1.T) @ w2.T) @ w3.T)[:, -1]
    """
    B, F = x.shape
    H1 = w1.shape[0]
    H2 = w2.shape[0]

    assert block_b % 128 == 0
    # Avoid huge padding for small B, keep the tile a multiple of 128.
    block_b = max(128, min(block_b, 128 * pl.cdiv(B, 128)))
    num_tiles = pl.cdiv(B, block_b)
    B_pad = num_tiles * block_b

    # Transposed, bf16 activations: batch on the lane axis -> lane-dense I/O.
    # (For very large production batches, feed x already as (F, B) to skip this
    # wrapper-side transpose pass over HBM.)
    xT = x.T.astype(jnp.bfloat16)
    if B_pad != B:
        xT = jnp.pad(xT, ((0, 0), (0, B_pad - B)))  # zero rows -> zero outputs

    w1b = w1.astype(jnp.bfloat16)
    w2b = w2.astype(jnp.bfloat16)
    w3c = w3[-1, :].astype(jnp.float32).reshape(H2, 1)  # fused [:, -1]

    yT = pl.pallas_call(
        mlp_kernel,
        out_shape=jax.ShapeDtypeStruct((1, B_pad), jnp.float32),
        grid=(num_tiles,),
        in_specs=[
            pl.BlockSpec((F, block_b), lambda i: (0, i)),  # stream x tiles
            pl.BlockSpec((H1, F), lambda i: (0, 0)),       # weights resident
            pl.BlockSpec((H2, H1), lambda i: (0, 0)),
            pl.BlockSpec((H2, 1), lambda i: (0, 0)),
        ],
        out_specs=pl.BlockSpec((1, block_b), lambda i: (0, i)),
        compiler_params=pltpu.CompilerParams(
            dimension_semantics=("parallel",),  # megacore sharding on v7x
        ),
    )(xT, w1b, w2b, w3c)

    return yT[0, :B]


def mlpnet_reference(x, w1, w2, w3):
    """Pure-JAX reference mirroring the kernel's bf16-input / f32-accumulate math."""
    h1 = jnp.maximum(
        jnp.dot(x.astype(jnp.bfloat16), w1.astype(jnp.bfloat16).T,
                preferred_element_type=jnp.float32), 0.0)
    h2 = jnp.maximum(
        jnp.dot(h1.astype(jnp.bfloat16), w2.astype(jnp.bfloat16).T,
                preferred_element_type=jnp.float32), 0.0)
    y = jnp.dot(h2, w3.astype(jnp.float32).T)
    return y[:, -1]


if __name__ == "__main__":
    # Small shapes consistent with the module: n_features=16, n_hidden='32,16',
    # n_output=8. B deliberately not a multiple of the batch tile to exercise
    # the padding/masking path; block_b=256 -> 3 grid steps.
    B, n_features = 600, 16
    n_hidden = [32, 16]
    n_output = 8

    key = jax.random.PRNGKey(0)
    kx, k1, k2, k3 = jax.random.split(key, 4)

    x = jax.random.normal(kx, (B, n_features), dtype=jnp.float32)
    # torch.nn.Linear weight layout: (out_features, in_features), bias=False.
    w1 = jax.random.normal(k1, (n_hidden[0], n_features), dtype=jnp.float32) * 0.1
    w2 = jax.random.normal(k2, (n_hidden[1], n_hidden[0]), dtype=jnp.float32) * 0.1
    w3 = jax.random.normal(k3, (n_output, n_hidden[1]), dtype=jnp.float32) * 0.1

    out = mlpnet_forward(x, w1, w2, w3, block_b=256)
    out = jax.block_until_ready(out)

    ref = mlpnet_reference(x, w1, w2, w3)
    assert out.shape == (B,)
    assert jnp.allclose(out, ref, atol=1e-3, rtol=1e-3), \
        float(jnp.max(jnp.abs(out - ref)))

    print("KERNEL_OK")
</pallas_src>

<mosaic_0001>
module attributes {stable_mosaic.version = 11 : i64} {
  func.func @mlp_kernel(%arg0: i32, %arg1: memref<16x256xbf16, #tpu.memory_space<vmem>>, %arg2: memref<32x16xbf16, #tpu.memory_space<vmem>>, %arg3: memref<16x32xbf16, #tpu.memory_space<vmem>>, %arg4: memref<16x1xf32, #tpu.memory_space<vmem>>, %arg5: memref<1x256xf32, #tpu.memory_space<vmem>>) attributes {dimension_semantics = [#tpu.dimension_semantics<parallel>], iteration_bounds = array<i64: 3>, scalar_prefetch = 0 : i64, scratch_operands = 0 : i64, tpu.core_type = #tpu.core_type<tc>, window_params = [{transform_indices = @transform_0, window_bounds = array<i64: 16, 256>}, {pipeline_mode = #tpu.pipeline_mode<synchronous>, transform_indices = @transform_1, window_bounds = array<i64: 32, 16>}, {pipeline_mode = #tpu.pipeline_mode<synchronous>, transform_indices = @transform_2, window_bounds = array<i64: 16, 32>}, {pipeline_mode = #tpu.pipeline_mode<synchronous>, transform_indices = @transform_3, window_bounds = array<i64: 16, 1>}, {transform_indices = @transform_4, window_bounds = array<i64: 1, 256>}]} {
    %c0 = arith.constant 0 : index
    %c0_0 = arith.constant 0 : index
    %0 = vector.load %arg1[%c0, %c0_0] : memref<16x256xbf16, #tpu.memory_space<vmem>>, vector<16x256xbf16>
    %c0_1 = arith.constant 0 : index
    %c0_2 = arith.constant 0 : index
    %1 = vector.load %arg2[%c0_1, %c0_2] : memref<32x16xbf16, #tpu.memory_space<vmem>>, vector<32x16xbf16>
    %cst = arith.constant dense<0.000000e+00> : vector<32x256xf32>
    %2 = tpu.matmul %1, %0, %cst {dimension_numbers = #tpu.dot_dimension_numbers<[1], [0], [0], [1], [0, 0, 1, 1], [], []>} : vector<32x16xbf16>, vector<16x256xbf16>, vector<32x256xf32> -> vector<32x256xf32>
    %cst_3 = arith.constant 0.000000e+00 : f32
    %3 = vector.broadcast %cst_3 : f32 to vector<32x256xf32>
    %4 = arith.maximumf %2, %3 : vector<32x256xf32>
    %c0_4 = arith.constant 0 : index
    %c0_5 = arith.constant 0 : index
    %5 = vector.load %arg3[%c0_4, %c0_5] : memref<16x32xbf16, #tpu.memory_space<vmem>>, vector<16x32xbf16>
    %6 = arith.truncf %4 : vector<32x256xf32> to vector<32x256xbf16>
    %cst_6 = arith.constant dense<0.000000e+00> : vector<16x256xf32>
    %7 = tpu.matmul %5, %6, %cst_6 {dimension_numbers = #tpu.dot_dimension_numbers<[1], [0], [0], [1], [0, 0, 1, 1], [], []>} : vector<16x32xbf16>, vector<32x256xbf16>, vector<16x256xf32> -> vector<16x256xf32>
    %cst_7 = arith.constant 0.000000e+00 : f32
    %8 = vector.broadcast %cst_7 : f32 to vector<16x256xf32>
    %9 = arith.maximumf %7, %8 : vector<16x256xf32>
    %c0_8 = arith.constant 0 : index
    %c0_9 = arith.constant 0 : index
    %10 = vector.load %arg4[%c0_8, %c0_9] : memref<16x1xf32, #tpu.memory_space<vmem>>, vector<16x1xf32>
    %11 = vector.broadcast %10 : vector<16x1xf32> to vector<16x256xf32>
    %12 = arith.mulf %9, %11 : vector<16x256xf32>
    %cst_10 = arith.constant dense<0.000000e+00> : vector<256xf32>
    %13 = vector.multi_reduction <add>, %12, %cst_10 [0] : vector<16x256xf32> to vector<256xf32>
    %14 = vector.shape_cast %13 : vector<256xf32> to vector<1x256xf32>
    %c0_11 = arith.constant 0 : index
    %c0_12 = arith.constant 0 : index
    %15 = vector.load %arg5[%c0_11, %c0_12] : memref<1x256xf32, #tpu.memory_space<vmem>>, vector<1x256xf32>
    tpu.vector_store %arg5[%c0_11, %c0_12], %14 {strides = array<i32>} : memref<1x256xf32, #tpu.memory_space<vmem>>, vector<1x256xf32>,
    return
  }
  func.func @transform_0(%arg0: i32) -> (i32, i32) {
    %c0_i32 = arith.constant 0 : i32
    %c0_i32_0 = arith.constant 0 : i32
    return %c0_i32, %arg0 : i32, i32
  }
  func.func @transform_1(%arg0: i32) -> (i32, i32) {
    %c0_i32 = arith.constant 0 : i32
    %c0_i32_0 = arith.constant 0 : i32
    %c0_i32_1 = arith.constant 0 : i32
    return %c0_i32, %c0_i32_0 : i32, i32
  }
  func.func @transform_2(%arg0: i32) -> (i32, i32) {
    %c0_i32 = arith.constant 0 : i32
    %c0_i32_0 = arith.constant 0 : i32
    %c0_i32_1 = arith.constant 0 : i32
    return %c0_i32, %c0_i32_0 : i32, i32
  }
  func.func @transform_3(%arg0: i32) -> (i32, i32) {
    %c0_i32 = arith.constant 0 : i32
    %c0_i32_0 = arith.constant 0 : i32
    %c0_i32_1 = arith.constant 0 : i32
    return %c0_i32, %c0_i32_0 : i32, i32
  }
  func.func @transform_4(%arg0: i32) -> (i32, i32) {
    %c0_i32 = arith.constant 0 : i32
    %c0_i32_0 = arith.constant 0 : i32
    return %c0_i32, %arg0 : i32, i32
  }
}

</mosaic_0001>

<bundles_post_ra>
// kernel: tpu_custom_call.1
= control target key start
LH: loop header
LB: loop body
LE: loop exit
PB: predicated region body
PF: predicated region fallthrough
CT: control target
= control target key end

     0   :  { %9 = vsyncpa [#allocation3], 0  ;;  %s901_s0 = inlined_call_operand.hbm [shape: bf16[16,768], index: 0, kind: input, shape index: {}]   ;;  %s902_s1 = inlined_call_operand.vmem [shape: bf16[32,16], index: 1, kind: input, shape index: {}]   ;;  %s903_s2 = inlined_call_operand.vmem [shape: bf16[16,32], index: 2, kind: input, shape index: {}]   ;;  %s904_s3 = inlined_call_operand.vmem [shape: f32[16,1], index: 3, kind: input, shape index: {}]   ;;  %s905_s4 = inlined_call_operand.hbm [shape: f32[1,768], index: 4, kind: output, shape index: {}]  }
   0x1   :  { %11 = vsyncpa [#allocation3 + $0x1], 0 }
   0x2   :  { %12 = vsyncpa [#allocation4], 0 }
   0x3   :  { %14 = vsyncpa [#allocation4 + $0x1], 0  ;;  %s725_s15 = smov 0   ;;  %s727_s16 = smov 0  }
   0x4   :  { %s729_s17 = smov 0   ;;  %s731_s18 = smov 0  }
   0x5 LB: > { %s746_s19 = sadd.s32 4294967295, %s691_s18   ;;  %s513_s20 = sadd.s32 4294967294, %s691_s18   ;;  %s691_s18 = sphi %s731_s18, %s918_s18   ;;  %s687_s17 = sphi %s729_s17, %s917_s17   ;;  %s683_s16 = sphi %s727_s16, %s916_s16   ;;  %s679_s15 = sphi %s725_s15, %s915_s15  }
   0x6   : > { %s750_s21 = sadd.s32 1, %s691_s18   ;;  %s27_s22 = sadd.s32 1, %s687_s17 }
   0x7   : > { %s24_s23 = ssub.s32 %s691_s18, %s750_s21  ;;  %p34_p0 = scmp.ne.s32.totalorder %s687_s17, %s683_s16 }
   0x8   : > { %p25_p1 = scmp.eq.s32.totalorder %s24_s23, 0  ;;  %p35_p2 = scmp.eq.s32.totalorder %s691_s18, 0 }
   0x9   : > { %p40_p3 = scmp.ne.s32.totalorder %s683_s16, %s679_s15  ;;  %p41_p4 = scmp.eq.s32.totalorder %s746_s19, 0 }
   0xa   : > { %s762_s24 = scalar_select %p25_p1, %s687_s17, %s27_s22  }
   0xb   : > { %p764_p5 = por %p35_p2, %p34_p0  ;;  %p768_p6 = por %p41_p4, %p40_p3 }
   0xc   : > { %p127_p7 = scmp.eq.s32.totalorder %s746_s19, 2  ;;  %p133_p8 = scmp.eq.s32.totalorder %s513_s20, 2 }
   0xd   : > { %p549_p9 = scmp.lt.s32.totalorder %s691_s18, 3  ;;  %s162_s29 = sand.u32 1, %s687_s17  }
   0xe   : > { %p774_p10 = por %p127_p7, %p34_p0  ;;  %p778_p11 = por %p133_p8, %p40_p3 }
   0xf   : > { %s535_s30 = sshll.u32 %s691_s18, 7  ;;  %s516_s5 = sshll.u32 %s162_s29, 4 }
  0x10   : > { %s909_s27 = scalar_select %p774_p10, 1, 0 }
  0x11   : > { %s910_s28 = scalar_select %p778_p11, 1, 0 }
  0x12   : > { %s787_s8 = scalar_lea.hbm %s901_s0, %s535_s30  ;;  %s166_s9 = scalar_lea.vmem [#allocation2], %s516_s5 }
  0x13   : > { %s173_s10 = sshll.u32 %s166_s9, 4  ;;  %p791_p12 = pnand %p549_p9, %p764_p5  ;;  %s795_s10 = int_to_ptr.vmem [resolvable:$true] %s173_s10 }
  0x14   : > { %s798_s12 = scalar_lea.sflag [#allocation3], %s162_s29  ;;  %s595_s13 = scalar_lea.hbm %s787_s8, 256 }
  0x15   : > { %p596_p0 = scmp.ne.s32.totalorder %s787_s8, %s595_s13  ;;  %p597_p1 = pneg %p791_p12 }
  0x16   : > { %s600_s22 = scalar_lea.hbm %s901_s0, 768  ;;  %p601_p4 = scmp.lt.u32.totalorder %s787_s8, %s901_s0 }
  0x17   : > { %p598_p2 = pnand %p597_p1, %p596_p0  ;;  %p602_p5 = scmp.lt.u32.totalorder %s600_s22, %s595_s13 }
  0x18   : > { %p604_p8 = scmp.lt.u32.totalorder %s595_s13, %s787_s8 }
  0x19   : > { %p599_p3 = pneg %p598_p2  ;;  %p603_p7 = por %p602_p5, %p601_p4 }
  0x1b   : > { %p605_p9 = por %p604_p8, %p603_p7 }
  0x1d   : > { %p606_p13 = pnand %p605_p9, %p599_p3 }
  0x1f   : > { %609 = shalt.err (!%p606_p13)
}
  0x20   : > { %s610_s29 = scalar_lea.vmem %s795_s10, 256  ;;  %s693_s30 = smov [#allocation2]  }
  0x21   : > { %p611_p0 = scmp.ne.s32.totalorder %s795_s10, %s610_s29  ;;  %s615_s5 = sshll.u32 %s693_s30, 4  ;;  %s616_s5 = int_to_ptr.vmem [resolvable:$false] %s615_s5 }
  0x22   : > { %s617_s6 = scalar_lea.vmem %s616_s5, 512  ;;  %p618_p10 = scmp.lt.s32.totalorder %s795_s10, %s616_s5 }
  0x23   : > { %p613_p2 = pnand %p611_p0, %p597_p1  ;;  %p619_p4 = scmp.lt.s32.totalorder %s617_s6, %s610_s29 }
  0x25   : > { %p614_p11 = pneg %p613_p2  ;;  %p620_p5 = por %p619_p4, %p618_p10 }
  0x27   : > { %p621_p7 = pnand %p620_p5, %p614_p11 }
  0x29   : > { %624 = shalt.err (!%p621_p7)
}
  0x2a   : > { %s694_s7 = smov 384   ;;  %s695_s9 = smov 128  }
  0x2b   : > { %s696_s13 = smov 8   ;;  %p181_p13 = scmp.lt.s32.totalorder %s691_s18, 4 }
  0x2c   : > { %544 = dma.hbm_to_vmem [thread:$0]  (!%p791_p12), %s787_s8, 256, %s795_s10, %s798_s12, %s694_s7, %s695_s9, %s696_s13  }
  0x2d   : > { %p912_p1 = scmp.ge.s32.totalorder %s691_s18, 1 }
  0x2f   : > { %p182_p3 = pnand %p912_p1, %p181_p13 }
  0x30   : > { %s830_s14 = sand.u32 (!%p182_p3), 1, %s683_s16  }
  0x31   : > { %185 = sbr.rel (%p182_p3) target bundleno = 547 (0x223), region = 36  ;;  %s520_s20 = sshll.u32 (!%p182_p3), %s830_s14, 4 }
  0x32   : > { %s188_s22 = scalar_lea.sflag (!%p182_p3), [#allocation3], %s830_s14  ;;  %s191_s23 = scalar_lea.vmem (!%p182_p3), [#allocation2], %s520_s20 }
  0x38   : > { %670 = dma.done.wait (%p768_p6), %s188_s22, 256  }
  0x39   : > { %672 = vsyncadd (%p768_p6), %s188_s22, 4294967040  ;;  %v697_v0 = vmov 0   ;;  %v589_v1 = vld [vmem:[%s191_s23 + $0x4] ss:$8 sps:$4 sm:$0xff]   ;;  %v591_v2 = vld [vmem:[%s191_s23] ss:$8 sps:$4 sm:$0xff]   ;;  %v411_v50 = vlaneseq }
  0x3a   : > { %284 = vmatprep.mubr.bf16.mxu0 %v697_v0  ;;  %360 = vmatprep.mubr.bf16.mxu1 %v697_v0  ;;  %v592_v3 = vld [vmem:[%s902_s1] sm:$0xff]   ;;  %vm245_vm0 = vcmask 130048   ;;  %v593_v4 = vld [vmem:[%s902_s1 + $0x8] sm:$0xff]   ;;  %vm324_vm1 = vcmask 261120   ;;  %v698_v48 = vmov 1966171168  }
  0x3b   : > { %588 = vset.pattern.permute.xlu0 %v697_v0  ;;  %252 = vmatprep.subr.bf16.mxu0 %v589_v1  ;;  %v375_v5 = vld [vmem:[%s904_s3] sm:$0xff]  ;;  %v376_v6 = vld [vmem:[%s904_s3 + $0x8] sm:$0xff]  ;;  %v409_v49 = vunpack.c.l.s4 %v698_v48  ;;  %v412_v56 = vshrl.u32 %v411_v50, 7  ;;  %s521_s7 = sshll.u32 %s830_s14, 1  ;;  %s536_s9 = sshll.u32 %s746_s19, 5  ;;  %vm425_vm2 = vcmp.lt.s32.totalorder %v411_v50, 256 }
  0x3c   : > { %253 = vmatpush1.bf16.msra.mxu0 %v591_v2  ;;  %379 = vperm.xlu0 %588, %v375_v5   ;;  %v594_v27 = vld [vmem:[%s903_s2] sm:$0xff]   ;;  %s215_s13 = scalar_lea.vmem [#allocation5], %s521_s7  ;;  %s858_s8 = scalar_lea.hbm %s905_s4, %s536_s9 }
  0x3d   : > { %v410_v55 = vunpack.c.0.s8 %v409_v49  ;;  %s443_s20 = sshll.u32 %s215_s13, 4  ;;  %s429_s10 = scalar_lea.sflag [#allocation4], %s830_s14  ;;  %s860_s20 = int_to_ptr.vmem [resolvable:$true] %s443_s20 }
  0x3e   : > { %s625_s11 = scalar_lea.vmem %s860_s20, 32  ;;  %p913_p10 = scmp.ne.s32.totalorder %s909_s27, 0 }
  0x3f   : > { %526 = vmatmul.mubr.msk.bf16.vlgmr.msra.gmra.mrb[0].mxu0 %vm245_vm0, %v592_v3  ;;  %v413_v61 = vsub.s32 %v410_v55, %v412_v56  ;;  %p626_p6 = scmp.ne.s32.totalorder %s860_s20, %s625_s11  ;;  %s699_s19 = smov [#allocation5]  }
  0x40   : > { %294 = vmatprep.mubr.bf16.mxu0 %v697_v0  ;;  %384 = vperm.xlu0 %588, %v376_v6   ;;  %s629_s12 = sshll.u32 %s699_s19, 4  ;;  %s630_s12 = int_to_ptr.vmem [resolvable:$false] %s629_s12 }
  0x41   : > { %p627_p11 = pnand %p626_p6, %p913_p10  ;;  %s631_s26 = scalar_lea.vmem %s630_s12, 64 }
  0x42   : > { %p632_p8 = scmp.lt.s32.totalorder %s860_s20, %s630_s12  ;;  %p633_p9 = scmp.lt.s32.totalorder %s631_s26, %s625_s11 }
  0x43   : > { %p628_p12 = pneg %p627_p11 }
  0x44   : > { %p634_p0 = por %p633_p9, %p632_p8 }
  0x46   : > { %p635_p2 = pnand %p634_p0, %p628_p12 }
  0x47   : > { %527 = vmatmul.mubr.msk.bf16.gmra.mrb[4].mxu0 %vm245_vm0, %v593_v4 }
  0xbb   : > { %v380_v28 = vpop.permute.xlu0 %379 }
  0xbf   : > { %v385_v36 = vpop.permute.xlu0 %384 }
 0x112   : > { %v286_v7 = vpop.f32.mrb[0].mxu0 }
 0x113   : > { %v288_v8 = vpop.f32.mrb[1].mxu0  ;;  %v305_v10 = vmax.f32 %v286_v7, 0.0 }
 0x114   : > { %v290_v9 = vpop.f32.mrb[2].mxu0  ;;  %v306_v13 = vmax.f32 %v288_v8, 0.0 }
 0x115   : > { %v307_v11 = vmax.f32 %v290_v9, 0.0  ;;  %v292_v12 = vpop.f32.mrb[3].mxu0 }
 0x116   : > { %v308_v14 = vmax.f32 %v292_v12, 0.0 }
 0x117   : > { %v315_v15 = vpack.c.bf16 %v307_v11, %v305_v10 }
 0x118   : > { %v316_v16 = vpack.c.bf16 %v308_v14, %v306_v13 }
 0x11a   : > { %v296_v17 = vpop.f32.mrb[4].mxu0  ;;  %328 = vmatprep.subr.bf16.mxu1 %v316_v16 }
 0x11b   : > { %v298_v18 = vpop.f32.mrb[5].mxu0  ;;  %329 = vmatpush1.bf16.msra.mxu1 %v315_v15  ;;  %v309_v20 = vmax.f32 %v296_v17, 0.0 }
 0x11c   : > { %v300_v19 = vpop.f32.mrb[6].mxu0  ;;  %v310_v23 = vmax.f32 %v298_v18, 0.0 }
 0x11d   : > { %v311_v21 = vmax.f32 %v300_v19, 0.0  ;;  %v302_v22 = vpop.f32.mrb[7].mxu0 }
 0x11e   : > { %v312_v24 = vmax.f32 %v302_v22, 0.0 }
 0x11f   : > { %v317_v25 = vpack.c.bf16 %v311_v21, %v309_v20 }
 0x120   : > { %v318_v26 = vpack.c.bf16 %v312_v24, %v310_v23 }
 0x122   : > { %330 = vmatprep.subr.bf16.mxu1 %v318_v26 }
 0x123   : > { %331 = vmatpush1.bf16.msra.mxu1 %v317_v25 }
 0x126   : > { %529 = vmatmul.mubr.msk.bf16.vlgmr.msra.gmra.mrb[0].mxu1 %vm324_vm1, %v594_v27 }
 0x1f9   : > { %v362_v29 = vpop.f32.mrb[0].mxu1 }
 0x1fa   : > { %v371_v30 = vmax.f32 %v362_v29, 0.0  ;;  %v364_v31 = vpop.f32.mrb[1].mxu1 }
 0x1fb   : > { %v372_v32 = vmax.f32 %v364_v31, 0.0  ;;  %v366_v33 = vpop.f32.mrb[2].mxu1 }
 0x1fc   : > { %v373_v34 = vmax.f32 %v366_v33, 0.0  ;;  %v368_v35 = vpop.f32.mrb[3].mxu1  ;;  %v387_v38 = vmul.f32 %v380_v28, %v371_v30 }
 0x1fd   : > { %v374_v37 = vmax.f32 %v368_v35, 0.0  ;;  %v388_v40 = vmul.f32 %v380_v28, %v372_v32 }
 0x1fe   : > { %v389_v39 = vmul.f32 %v385_v36, %v373_v34 }
 0x1ff   : > { %v390_v41 = vmul.f32 %v385_v36, %v374_v37 }
 0x200   : > { %v391_v42 = vadd.f32 %v389_v39, %v387_v38 }
 0x201   : > { %v398_v43 = vadd.f32 %v390_v41, %v388_v40 }
 0x202   : > { %v392_v44 = vrot.slane %v391_v42, 4 }
 0x203   : > { %v399_v45 = vrot.slane %v398_v43, 4 }
 0x204   : > { %v393_v46 = vadd.f32 %v392_v44, %v391_v42 }
 0x205   : > { %v400_v47 = vadd.f32 %v399_v45, %v398_v43 }
 0x206   : > { %v394_v51 = vrot.slane %v393_v46, 2 }
 0x207   : > { %v401_v52 = vrot.slane %v400_v47, 2 }
 0x208   : > { %v395_v53 = vadd.f32 %v394_v51, %v393_v46 }
 0x209   : > { %v402_v54 = vadd.f32 %v401_v52, %v400_v47 }
 0x20a   : > { %v396_v57 = vrot.slane %v395_v53, 1 }
 0x20b   : > { %v403_v58 = vrot.slane %v402_v54, 1 }
 0x20c   : > { %v397_v59 = vadd.f32 %v396_v57, %v395_v53 }
 0x20d   : > { %v404_v60 = vadd.f32 %v403_v58, %v402_v54 }
 0x20f   : > { %v407_v62 = vcombine.low %v397_v59, %v404_v60 }
 0x211   : > { %v414_v63 = vrot.slane %v407_v62, %v413_v61 }
 0x213   : > { %v421_v0 = vrot.slane %v414_v63, %v413_v61 }
 0x215   : > { %427 = vst.msk [vmem:[%s215_s13] sm:$0x3] %vm425_vm2, %v421_v0 }
 0x216   : > { %638 = shalt.err (!%p635_p2)
}
 0x217   : > { %s639_s14 = scalar_lea.hbm %s858_s8, 32  ;;  %s643_s30 = scalar_lea.hbm %s905_s4, 96 }
 0x218   : > { %p640_p4 = scmp.ne.s32.totalorder %s858_s8, %s639_s14  ;;  %p644_p13 = scmp.lt.u32.totalorder %s858_s8, %s905_s4 }
 0x219   : > { %p645_p1 = scmp.lt.u32.totalorder %s643_s30, %s639_s14  ;;  %p647_p6 = scmp.lt.u32.totalorder %s639_s14, %s858_s8 }
 0x21a   : > { %p641_p5 = pnand %p640_p4, %p913_p10 }
 0x21b   : > { %p646_p3 = por %p645_p1, %p644_p13 }
 0x21c   : > { %p642_p7 = pneg %p641_p5 }
 0x21d   : > { %p648_p11 = por %p647_p6, %p646_p3 }
 0x21f   : > { %p649_p12 = pnand %p648_p11, %p642_p7 }
 0x221   : > { %652 = shalt.err (!%p649_p12)
}
 0x222   : > { %539 = dma.vmem_to_hbm [thread:$0]  (%p913_p10), %s860_s20, 32, %s858_s8, %s429_s10  }
 0x223 PF: > { %p550_p8 = scmp.ge.s32.totalorder %s691_s18, 2  ;;  %s455_s7 = sand.u32 1, %s679_s15  }
 0x224   : > { %p914_p9 = scmp.ne.s32.totalorder %s910_s28, 0  ;;  %s456_s9 = scalar_lea.sflag [#allocation4], %s455_s7 }
 0x226   : > { %p546_p0 = pnand %p550_p8, %p914_p9 }
 0x228   : > { %674 = dma.done.wait (!%p546_p0), %s456_s9, 32  }
 0x229   : > { %676 = vsyncadd (!%p546_p0), %s456_s9, 4294967264  ;;  %p17_p2 = scmp.ge.s32.totalorder %s750_s21, 5   ;;  %s915_s15 = smov %s683_s16 }
 0x22a   : > { %s916_s16 = smov %s687_s17  ;;  %s917_s17 = smov %s762_s24 }
 0x22b   : > { %s918_s18 = smov %s750_s21  ;;  %19 = sbr.rel (!%p17_p2) target bundleno = 5 (0x5), region = 81 }
 0x232   :  { %461 = vsyncpa [#allocation3], 1 }
 0x233   :  { %463 = vsyncpa [#allocation3 + $0x1], 1 }
 0x234   :  { %464 = vsyncpa [#allocation4], 1 }
 0x235   :  { %466 = vsyncpa [#allocation4 + $0x1], 1 }

</bundles_post_ra>
